<compile_context>
chip_gen: v5e
topology: v5e:2x2
jax: 0.10.0
libtpu: 0.0.40
codegen_flags: <defaults>
</compile_context>

<pallas_src>
import functools

import jax
import jax.numpy as jnp
from jax import lax
from jax.experimental import pallas as pl
from jax.experimental.pallas import tpu as pltpu

LAMBDA_1 = 1.0
LAMBDA_2 = 1.0


def _cyclip_kernel(inv_temp_ref,   # SMEM (1,)   f32  1 / sigmoid(logit_temperature)
                   sim_row_ref,    # VMEM (TM, N)     row strip of sim
                   sim_col_ref,    # VMEM (N, TM)     matching column strip of sim
                   img_ref,        # VMEM (TM, D)     image feature rows
                   txt_ref,        # VMEM (TM, D)     text feature rows
                   out_ref,        # SMEM (1, 1) f32  scalar loss
                   m_sc,           # VMEM (1, N) f32  running column max
                   l_sc,           # VMEM (1, N) f32  running column sum-exp
                   diag_sc,        # VMEM (1, 1) f32  sum(diag(logits))
                   lse1_sc,        # VMEM (1, 1) f32  sum of row-wise lse
                   sym_sc,         # VMEM (1, 1) f32  sum (S - S^T)^2
                   gaa_sc,         # VMEM (D, D) f32  A^T A accumulator
                   gab_sc,         # VMEM (D, D) f32  A^T B accumulator
                   gbb_sc):        # VMEM (D, D) f32  B^T B accumulator
    i = pl.program_id(0)
    tm, n = sim_row_ref.shape

    @pl.when(i == 0)
    def _init():
        m_sc[...] = jnp.full_like(m_sc, -jnp.inf)
        l_sc[...] = jnp.zeros_like(l_sc)
        diag_sc[...] = jnp.zeros_like(diag_sc)
        lse1_sc[...] = jnp.zeros_like(lse1_sc)
        sym_sc[...] = jnp.zeros_like(sym_sc)
        gaa_sc[...] = jnp.zeros_like(gaa_sc)
        gab_sc[...] = jnp.zeros_like(gab_sc)
        gbb_sc[...] = jnp.zeros_like(gbb_sc)

    inv_temp = inv_temp_ref[0]
    sim_row = sim_row_ref[...].astype(jnp.float32)            # (TM, N)
    logits = sim_row * inv_temp

    # ---- contrastive terms -------------------------------------------------
    # Diagonal of logits in this strip lives entirely inside the (TM, TM)
    # diagonal sub-block starting at column i*TM: slice it, mask, reduce.
    if tm == n:
        diag_blk = logits                                     # single full tile
    else:
        start = pl.multiple_of(i * tm, tm)
        diag_blk = sim_row_ref[:, pl.ds(start, tm)].astype(jnp.float32) * inv_temp
    eye_mask = (lax.broadcasted_iota(jnp.int32, (tm, tm), 0)
                == lax.broadcasted_iota(jnp.int32, (tm, tm), 1))
    diag_sc[...] += jnp.sum(jnp.where(eye_mask, diag_blk, 0.0))

    # Row-wise (dim=1) logsumexp: the full row is present in this strip.
    m1 = jnp.max(logits, axis=1, keepdims=True)               # (TM, 1)
    lse1 = m1 + jnp.log(jnp.sum(jnp.exp(logits - m1), axis=1, keepdims=True))
    lse1_sc[...] += jnp.sum(lse1)

    # Column-wise (dim=0) logsumexp: online accumulation across row strips.
    m_new = jnp.maximum(m_sc[...], jnp.max(logits, axis=0, keepdims=True))
    l_sc[...] = (l_sc[...] * jnp.exp(m_sc[...] - m_new)
                 + jnp.sum(jnp.exp(logits - m_new), axis=0, keepdims=True))
    m_sc[...] = m_new

    # ---- symmetry term -----------------------------------------------------
    # sim_col_ref holds sim[:, i*TM:(i+1)*TM]; its per-tile transpose gives
    # the matching rows of S^T (no global N x N transpose).
    sim_colT = sim_col_ref[...].astype(jnp.float32).T         # (TM, N)
    d_sym = sim_row - sim_colT
    sym_sc[...] += jnp.sum(d_sym * d_sym)

    # ---- modality term: accumulate DxD Gram factors (contract batch axis) --
    tn_dims = (((0,), (0,)), ((), ()))   # A^T A style matmul, no transpose
    a = img_ref[...]
    b = txt_ref[...]
    gaa_sc[...] += lax.dot_general(a, a, tn_dims,
                                   preferred_element_type=jnp.float32)
    gab_sc[...] += lax.dot_general(a, b, tn_dims,
                                   preferred_element_type=jnp.float32)
    gbb_sc[...] += lax.dot_general(b, b, tn_dims,
                                   preferred_element_type=jnp.float32)

    # ---- finalize on the last row strip ------------------------------------
    @pl.when(i == pl.num_programs(0) - 1)
    def _finalize():
        n_f = jnp.float32(n)
        lse0_sum = jnp.sum(m_sc[...] + jnp.log(l_sc[...]))    # column lse sum
        sum_diag = jnp.sum(diag_sc[...])
        sum_lse1 = jnp.sum(lse1_sc[...])
        caption_loss = (lse0_sum - sum_diag) / n_f             # dim=0 softmax
        image_loss = (sum_lse1 - sum_diag) / n_f               # dim=1 softmax
        symmetry_loss = jnp.sum(sym_sc[...]) / (n_f * n_f)
        # ||A A^T - B B^T||_F^2 = ||A^T A||^2 - 2||A^T B||^2 + ||B^T B||^2
        mod_sum = (jnp.sum(gaa_sc[...] * gaa_sc[...])
                   - 2.0 * jnp.sum(gab_sc[...] * gab_sc[...])
                   + jnp.sum(gbb_sc[...] * gbb_sc[...]))
        modality_loss = mod_sum / (n_f * n_f)
        out_ref[0, 0] = (0.5 * (caption_loss + image_loss)
                         + LAMBDA_1 * symmetry_loss
                         + LAMBDA_2 * modality_loss)


def _pick_row_tile(n, bytes_per_elem, budget_bytes=32 * 1024 * 1024):
    """Largest lane-aligned row tile whose (double-buffered) row+col strips fit."""
    # The swapped (column) spec makes TM a lane dimension, so a partial tile
    # must be a multiple of 128 and divide N; otherwise use one full tile.
    if n % 128 != 0:
        return n
    for tm in (512, 256, 128):
        if n % tm == 0 and 4 * tm * n * bytes_per_elem <= budget_bytes:
            return tm
    return 128  # best effort for very large N; vmem_limit is sized below


@functools.partial(jax.jit, static_argnames=("tile_m",))
def cyclip_loss(similarity_matrix, image_features, text_features,
                logit_temperature, tile_m=None):
    n = similarity_matrix.shape[0]
    d = image_features.shape[1]
    sim_bpe = jnp.dtype(similarity_matrix.dtype).itemsize
    feat_bpe = jnp.dtype(image_features.dtype).itemsize

    tm = tile_m if tile_m is not None else _pick_row_tile(n, sim_bpe)
    if tm != n and (n % tm != 0 or tm % 128 != 0):
        raise ValueError(f"tile_m={tm} must divide N={n} and be a multiple of 128")
    grid = (n // tm,)

    # Scalar parameter glue: 1 / sigmoid(learnable temperature).
    inv_temp = (1.0 / jax.nn.sigmoid(
        jnp.asarray(logit_temperature, jnp.float32))).reshape((1,))

    # VMEM footprint: double-buffered row + column strips, feature strips,
    # plus f32 scratch; leave ~8 MiB headroom.
    strips_bytes = 4 * tm * n * sim_bpe + 4 * tm * d * feat_bpe
    scratch_bytes = 2 * n * 4 + 3 * d * d * 4 + 5 * 4
    vmem_limit = int(min(100 * 1024 * 1024,
                         strips_bytes + scratch_bytes + (8 << 20)))

    out = pl.pallas_call(
        _cyclip_kernel,
        out_shape=jax.ShapeDtypeStruct((1, 1), jnp.float32),
        grid_spec=pltpu.PrefetchScalarGridSpec(
            num_scalar_prefetch=0,
            grid=grid,
            in_specs=[
                pl.BlockSpec(memory_space=pltpu.SMEM),      # 1/temperature
                pl.BlockSpec((tm, n), lambda i: (i, 0)),    # sim row strip
                pl.BlockSpec((n, tm), lambda i: (0, i)),    # sim column strip
                pl.BlockSpec((tm, d), lambda i: (i, 0)),    # image feature rows
                pl.BlockSpec((tm, d), lambda i: (i, 0)),    # text feature rows
            ],
            out_specs=pl.BlockSpec(memory_space=pltpu.SMEM),
            scratch_shapes=[
                pltpu.VMEM((1, n), jnp.float32),   # running column max
                pltpu.VMEM((1, n), jnp.float32),   # running column sum-exp
                pltpu.VMEM((1, 1), jnp.float32),   # sum(diag(logits))
                pltpu.VMEM((1, 1), jnp.float32),   # sum of row lse
                pltpu.VMEM((1, 1), jnp.float32),   # symmetry sum
                pltpu.VMEM((d, d), jnp.float32),   # A^T A
                pltpu.VMEM((d, d), jnp.float32),   # A^T B
                pltpu.VMEM((d, d), jnp.float32),   # B^T B
            ]),
        compiler_params=pltpu.CompilerParams(
            dimension_semantics=("arbitrary",),      # sequential reduction axis
            vmem_limit_bytes=vmem_limit),
    )(inv_temp, similarity_matrix, similarity_matrix,
      image_features, text_features)
    return out[0, 0]


def cyclip_loss_ref(similarity_matrix, image_features, text_features,
                    logit_temperature):
    """Pure-JAX reference (mirrors the PyTorch module)."""
    temperature = jax.nn.sigmoid(jnp.asarray(logit_temperature, jnp.float32))
    logits = similarity_matrix.astype(jnp.float32) / temperature

    def contrastive(lg, axis):
        lsm = jax.nn.log_softmax(lg, axis=axis)
        return -jnp.mean(jnp.diag(lsm))

    caption_loss = contrastive(logits, 0)
    image_loss = contrastive(logits, 1)
    symmetry_loss = jnp.mean((similarity_matrix - similarity_matrix.T) ** 2)
    img = image_features.astype(jnp.float32)
    txt = text_features.astype(jnp.float32)
    modality_loss = jnp.mean((img @ img.T - txt @ txt.T) ** 2)
    return 0.5 * (caption_loss + image_loss) + symmetry_loss + modality_loss


if __name__ == "__main__":
    key = jax.random.PRNGKey(0)
    logit_temperature = -1.0  # deterministic init, as in the module

    k1, k2, k3, k4, k5, k6 = jax.random.split(key, 6)

    # Case 1: toy shapes (single full-array tile path).
    sim_s = jax.random.normal(k1, (8, 8), dtype=jnp.float32)
    img_s = jax.random.normal(k2, (8, 32), dtype=jnp.float32)
    txt_s = jax.random.normal(k3, (8, 32), dtype=jnp.float32)
    loss_s = cyclip_loss(sim_s, img_s, txt_s, logit_temperature)
    jax.block_until_ready(loss_s)
    ref_s = cyclip_loss_ref(sim_s, img_s, txt_s, logit_temperature)
    assert jnp.allclose(loss_s, ref_s, rtol=1e-4, atol=1e-4), (loss_s, ref_s)

    # Case 2: lane-aligned multi-strip grid (exercises the online column
    # logsumexp, the sliced diag block, the swapped-index symmetry spec and
    # the DxD Gram accumulators).
    sim_m = jax.random.normal(k4, (256, 256), dtype=jnp.float32)
    img_m = jax.random.normal(k5, (256, 64), dtype=jnp.float32)
    txt_m = jax.random.normal(k6, (256, 64), dtype=jnp.float32)
    loss_m = cyclip_loss(sim_m, img_m, txt_m, logit_temperature, tile_m=128)
    jax.block_until_ready(loss_m)
    ref_m = cyclip_loss_ref(sim_m, img_m, txt_m, logit_temperature)
    assert jnp.allclose(loss_m, ref_m, rtol=1e-4, atol=1e-4), (loss_m, ref_m)

    print("KERNEL_OK")
</pallas_src>

<mosaic_0001>
module attributes {stable_mosaic.version = 11 : i64} {
  func.func @_cyclip_kernel(%arg0: i32, %arg1: memref<1xf32, #tpu.memory_space<smem>>, %arg2: memref<8x8xf32, #tpu.memory_space<vmem>>, %arg3: memref<8x8xf32, #tpu.memory_space<vmem>>, %arg4: memref<8x32xf32, #tpu.memory_space<vmem>>, %arg5: memref<8x32xf32, #tpu.memory_space<vmem>>, %arg6: memref<1x1xf32, #tpu.memory_space<smem>>, %arg7: memref<1x8xf32, #tpu.memory_space<vmem>>, %arg8: memref<1x8xf32, #tpu.memory_space<vmem>>, %arg9: memref<1x1xf32, #tpu.memory_space<vmem>>, %arg10: memref<1x1xf32, #tpu.memory_space<vmem>>, %arg11: memref<1x1xf32, #tpu.memory_space<vmem>>, %arg12: memref<32x32xf32, #tpu.memory_space<vmem>>, %arg13: memref<32x32xf32, #tpu.memory_space<vmem>>, %arg14: memref<32x32xf32, #tpu.memory_space<vmem>>) attributes {dimension_semantics = [#tpu.dimension_semantics<arbitrary>], iteration_bounds = array<i64: 1>, scalar_prefetch = 0 : i64, scratch_operands = 8 : i64, tpu.core_type = #tpu.core_type<tc>, window_params = [{transform_indices = @transform_0, window_bounds = array<i64: 1>}, {transform_indices = @transform_1, window_bounds = array<i64: 8, 8>}, {transform_indices = @transform_2, window_bounds = array<i64: 8, 8>}, {transform_indices = @transform_3, window_bounds = array<i64: 8, 32>}, {transform_indices = @transform_4, window_bounds = array<i64: 8, 32>}, {transform_indices = @transform_5, window_bounds = array<i64: 1, 1>}]} {
    %c0_i32 = arith.constant 0 : i32
    %0 = arith.cmpi eq, %arg0, %c0_i32 : i32
    %1 = arith.extui %0 : i1 to i32
    %c0_i32_0 = arith.constant 0 : i32
    %2 = arith.cmpi ne, %1, %c0_i32_0 : i32
    scf.if %2 {
      %cst_55 = arith.constant 0xFF800000 : f32
      %83 = vector.broadcast %cst_55 : f32 to vector<1x8xf32>
      %c0_56 = arith.constant 0 : index
      %c0_57 = arith.constant 0 : index
      %84 = vector.load %arg7[%c0_56, %c0_57] : memref<1x8xf32, #tpu.memory_space<vmem>>, vector<1x8xf32>
      tpu.vector_store %arg7[%c0_56, %c0_57], %83 {strides = array<i32>} : memref<1x8xf32, #tpu.memory_space<vmem>>, vector<1x8xf32>,
      %cst_58 = arith.constant 0.000000e+00 : f32
      %85 = vector.broadcast %cst_58 : f32 to vector<1x8xf32>
      %c0_59 = arith.constant 0 : index
      %c0_60 = arith.constant 0 : index
      %86 = vector.load %arg8[%c0_59, %c0_60] : memref<1x8xf32, #tpu.memory_space<vmem>>, vector<1x8xf32>
      tpu.vector_store %arg8[%c0_59, %c0_60], %85 {strides = array<i32>} : memref<1x8xf32, #tpu.memory_space<vmem>>, vector<1x8xf32>,
      %cst_61 = arith.constant 0.000000e+00 : f32
      %87 = vector.broadcast %cst_61 : f32 to vector<1x1xf32>
      %c0_62 = arith.constant 0 : index
      %c0_63 = arith.constant 0 : index
      %88 = vector.load %arg9[%c0_62, %c0_63] : memref<1x1xf32, #tpu.memory_space<vmem>>, vector<1x1xf32>
      tpu.vector_store %arg9[%c0_62, %c0_63], %87 {strides = array<i32>} : memref<1x1xf32, #tpu.memory_space<vmem>>, vector<1x1xf32>,
      %cst_64 = arith.constant 0.000000e+00 : f32
      %89 = vector.broadcast %cst_64 : f32 to vector<1x1xf32>
      %c0_65 = arith.constant 0 : index
      %c0_66 = arith.constant 0 : index
      %90 = vector.load %arg10[%c0_65, %c0_66] : memref<1x1xf32, #tpu.memory_space<vmem>>, vector<1x1xf32>
      tpu.vector_store %arg10[%c0_65, %c0_66], %89 {strides = array<i32>} : memref<1x1xf32, #tpu.memory_space<vmem>>, vector<1x1xf32>,
      %cst_67 = arith.constant 0.000000e+00 : f32
      %91 = vector.broadcast %cst_67 : f32 to vector<1x1xf32>
      %c0_68 = arith.constant 0 : index
      %c0_69 = arith.constant 0 : index
      %92 = vector.load %arg11[%c0_68, %c0_69] : memref<1x1xf32, #tpu.memory_space<vmem>>, vector<1x1xf32>
      tpu.vector_store %arg11[%c0_68, %c0_69], %91 {strides = array<i32>} : memref<1x1xf32, #tpu.memory_space<vmem>>, vector<1x1xf32>,
      %cst_70 = arith.constant 0.000000e+00 : f32
      %93 = vector.broadcast %cst_70 : f32 to vector<32x32xf32>
      %c0_71 = arith.constant 0 : index
      %c0_72 = arith.constant 0 : index
      %94 = vector.load %arg12[%c0_71, %c0_72] : memref<32x32xf32, #tpu.memory_space<vmem>>, vector<32x32xf32>
      tpu.vector_store %arg12[%c0_71, %c0_72], %93 {strides = array<i32>} : memref<32x32xf32, #tpu.memory_space<vmem>>, vector<32x32xf32>,
      %cst_73 = arith.constant 0.000000e+00 : f32
      %95 = vector.broadcast %cst_73 : f32 to vector<32x32xf32>
      %c0_74 = arith.constant 0 : index
      %c0_75 = arith.constant 0 : index
      %96 = vector.load %arg13[%c0_74, %c0_75] : memref<32x32xf32, #tpu.memory_space<vmem>>, vector<32x32xf32>
      tpu.vector_store %arg13[%c0_74, %c0_75], %95 {strides = array<i32>} : memref<32x32xf32, #tpu.memory_space<vmem>>, vector<32x32xf32>,
      %cst_76 = arith.constant 0.000000e+00 : f32
      %97 = vector.broadcast %cst_76 : f32 to vector<32x32xf32>
      %c0_77 = arith.constant 0 : index
      %c0_78 = arith.constant 0 : index
      %98 = vector.load %arg14[%c0_77, %c0_78] : memref<32x32xf32, #tpu.memory_space<vmem>>, vector<32x32xf32>
      tpu.vector_store %arg14[%c0_77, %c0_78], %97 {strides = array<i32>} : memref<32x32xf32, #tpu.memory_space<vmem>>, vector<32x32xf32>,
    } else {
    }
    %c0 = arith.constant 0 : index
    %3 = memref.load %arg1[%c0] : memref<1xf32, #tpu.memory_space<smem>>
    %c0_1 = arith.constant 0 : index
    %c0_2 = arith.constant 0 : index
    %4 = vector.load %arg2[%c0_1, %c0_2] : memref<8x8xf32, #tpu.memory_space<vmem>>, vector<8x8xf32>
    %5 = vector.broadcast %3 : f32 to vector<8x8xf32>
    %6 = arith.mulf %4, %5 : vector<8x8xf32>
    %7 = tpu.iota {dimensions = array<i32: 0>} : vector<8x8xi32>
    %8 = tpu.iota {dimensions = array<i32: 1>} : vector<8x8xi32>
    %9 = arith.cmpi eq, %7, %8 : vector<8x8xi32>
    %c0_3 = arith.constant 0 : index
    %c0_4 = arith.constant 0 : index
    %10 = vector.load %arg9[%c0_3, %c0_4] : memref<1x1xf32, #tpu.memory_space<vmem>>, vector<1x1xf32>
    %cst = arith.constant 0.000000e+00 : f32
    %11 = vector.broadcast %cst : f32 to vector<8x8xf32>
    %12 = arith.select %9, %6, %11 : vector<8x8xi1>, vector<8x8xf32>
    %13 = vector.shape_cast %12 : vector<8x8xf32> to vector<1x8x8xf32>
    %cst_5 = arith.constant dense<0.000000e+00> : vector<1xf32>
    %14 = vector.multi_reduction <add>, %13, %cst_5 [1, 2] : vector<1x8x8xf32> to vector<1xf32>
    %15 = vector.shape_cast %14 : vector<1xf32> to vector<1x1x1xf32>
    %16 = vector.extract %15[0, 0, 0] : f32 from vector<1x1x1xf32>
    %17 = vector.broadcast %16 : f32 to vector<1x1xf32>
    %18 = arith.addf %10, %17 : vector<1x1xf32>
    %c0_6 = arith.constant 0 : index
    %c0_7 = arith.constant 0 : index
    %19 = vector.load %arg9[%c0_6, %c0_7] : memref<1x1xf32, #tpu.memory_space<vmem>>, vector<1x1xf32>
    tpu.vector_store %arg9[%c0_6, %c0_7], %18 {strides = array<i32>} : memref<1x1xf32, #tpu.memory_space<vmem>>, vector<1x1xf32>,
    %cst_8 = arith.constant dense<0xFF800000> : vector<8xf32>
    %20 = vector.multi_reduction <maximumf>, %6, %cst_8 [1] : vector<8x8xf32> to vector<8xf32>
    %21 = vector.shape_cast %20 : vector<8xf32> to vector<8x1xf32>
    %22 = vector.broadcast %21 : vector<8x1xf32> to vector<8x8xf32>
    %23 = arith.subf %6, %22 : vector<8x8xf32>
    %24 = math.exp %23 : vector<8x8xf32>
    %cst_9 = arith.constant dense<0.000000e+00> : vector<8xf32>
    %25 = vector.multi_reduction <add>, %24, %cst_9 [1] : vector<8x8xf32> to vector<8xf32>
    %26 = vector.shape_cast %25 : vector<8xf32> to vector<8x1xf32>
    %27 = math.log %26 : vector<8x1xf32>
    %28 = arith.addf %21, %27 : vector<8x1xf32>
    %c0_10 = arith.constant 0 : index
    %c0_11 = arith.constant 0 : index
    %29 = vector.load %arg10[%c0_10, %c0_11] : memref<1x1xf32, #tpu.memory_space<vmem>>, vector<1x1xf32>
    %30 = vector.shape_cast %28 : vector<8x1xf32> to vector<1x8x1xf32>
    %cst_12 = arith.constant dense<0.000000e+00> : vector<1xf32>
    %31 = vector.multi_reduction <add>, %30, %cst_12 [1, 2] : vector<1x8x1xf32> to vector<1xf32>
    %32 = vector.shape_cast %31 : vector<1xf32> to vector<1x1x1xf32>
    %33 = vector.extract %32[0, 0, 0] : f32 from vector<1x1x1xf32>
    %34 = vector.broadcast %33 : f32 to vector<1x1xf32>
    %35 = arith.addf %29, %34 : vector<1x1xf32>
    %c0_13 = arith.constant 0 : index
    %c0_14 = arith.constant 0 : index
    %36 = vector.load %arg10[%c0_13, %c0_14] : memref<1x1xf32, #tpu.memory_space<vmem>>, vector<1x1xf32>
    tpu.vector_store %arg10[%c0_13, %c0_14], %35 {strides = array<i32>} : memref<1x1xf32, #tpu.memory_space<vmem>>, vector<1x1xf32>,
    %c0_15 = arith.constant 0 : index
    %c0_16 = arith.constant 0 : index
    %37 = vector.load %arg7[%c0_15, %c0_16] : memref<1x8xf32, #tpu.memory_space<vmem>>, vector<1x8xf32>
    %cst_17 = arith.constant dense<0xFF800000> : vector<8xf32>
    %38 = vector.multi_reduction <maximumf>, %6, %cst_17 [0] : vector<8x8xf32> to vector<8xf32>
    %39 = vector.shape_cast %38 : vector<8xf32> to vector<1x8xf32>
    %40 = arith.maximumf %37, %39 : vector<1x8xf32>
    %c0_18 = arith.constant 0 : index
    %c0_19 = arith.constant 0 : index
    %41 = vector.load %arg8[%c0_18, %c0_19] : memref<1x8xf32, #tpu.memory_space<vmem>>, vector<1x8xf32>
    %c0_20 = arith.constant 0 : index
    %c0_21 = arith.constant 0 : index
    %42 = vector.load %arg7[%c0_20, %c0_21] : memref<1x8xf32, #tpu.memory_space<vmem>>, vector<1x8xf32>
    %43 = arith.subf %42, %40 : vector<1x8xf32>
    %44 = math.exp %43 : vector<1x8xf32>
    %45 = arith.mulf %41, %44 : vector<1x8xf32>
    %46 = vector.broadcast %40 : vector<1x8xf32> to vector<8x8xf32>
    %47 = arith.subf %6, %46 : vector<8x8xf32>
    %48 = math.exp %47 : vector<8x8xf32>
    %cst_22 = arith.constant dense<0.000000e+00> : vector<8xf32>
    %49 = vector.multi_reduction <add>, %48, %cst_22 [0] : vector<8x8xf32> to vector<8xf32>
    %50 = vector.shape_cast %49 : vector<8xf32> to vector<1x8xf32>
    %51 = arith.addf %45, %50 : vector<1x8xf32>
    %c0_23 = arith.constant 0 : index
    %c0_24 = arith.constant 0 : index
    %52 = vector.load %arg8[%c0_23, %c0_24] : memref<1x8xf32, #tpu.memory_space<vmem>>, vector<1x8xf32>
    tpu.vector_store %arg8[%c0_23, %c0_24], %51 {strides = array<i32>} : memref<1x8xf32, #tpu.memory_space<vmem>>, vector<1x8xf32>,
    %c0_25 = arith.constant 0 : index
    %c0_26 = arith.constant 0 : index
    %53 = vector.load %arg7[%c0_25, %c0_26] : memref<1x8xf32, #tpu.memory_space<vmem>>, vector<1x8xf32>
    tpu.vector_store %arg7[%c0_25, %c0_26], %40 {strides = array<i32>} : memref<1x8xf32, #tpu.memory_space<vmem>>, vector<1x8xf32>,
    %c0_27 = arith.constant 0 : index
    %c0_28 = arith.constant 0 : index
    %54 = vector.load %arg3[%c0_27, %c0_28] : memref<8x8xf32, #tpu.memory_space<vmem>>, vector<8x8xf32>
    %55 = tpu.transpose %54, [1, 0] : vector<8x8xf32> -> vector<8x8xf32>
    %56 = arith.subf %4, %55 : vector<8x8xf32>
    %c0_29 = arith.constant 0 : index
    %c0_30 = arith.constant 0 : index
    %57 = vector.load %arg11[%c0_29, %c0_30] : memref<1x1xf32, #tpu.memory_space<vmem>>, vector<1x1xf32>
    %58 = arith.mulf %56, %56 : vector<8x8xf32>
    %59 = vector.shape_cast %58 : vector<8x8xf32> to vector<1x8x8xf32>
    %cst_31 = arith.constant dense<0.000000e+00> : vector<1xf32>
    %60 = vector.multi_reduction <add>, %59, %cst_31 [1, 2] : vector<1x8x8xf32> to vector<1xf32>
    %61 = vector.shape_cast %60 : vector<1xf32> to vector<1x1x1xf32>
    %62 = vector.extract %61[0, 0, 0] : f32 from vector<1x1x1xf32>
    %63 = vector.broadcast %62 : f32 to vector<1x1xf32>
    %64 = arith.addf %57, %63 : vector<1x1xf32>
    %c0_32 = arith.constant 0 : index
    %c0_33 = arith.constant 0 : index
    %65 = vector.load %arg11[%c0_32, %c0_33] : memref<1x1xf32, #tpu.memory_space<vmem>>, vector<1x1xf32>
    tpu.vector_store %arg11[%c0_32, %c0_33], %64 {strides = array<i32>} : memref<1x1xf32, #tpu.memory_space<vmem>>, vector<1x1xf32>,
    %c0_34 = arith.constant 0 : index
    %c0_35 = arith.constant 0 : index
    %66 = vector.load %arg4[%c0_34, %c0_35] : memref<8x32xf32, #tpu.memory_space<vmem>>, vector<8x32xf32>
    %c0_36 = arith.constant 0 : index
    %c0_37 = arith.constant 0 : index
    %67 = vector.load %arg5[%c0_36, %c0_37] : memref<8x32xf32, #tpu.memory_space<vmem>>, vector<8x32xf32>
    %c0_38 = arith.constant 0 : index
    %c0_39 = arith.constant 0 : index
    %68 = vector.load %arg12[%c0_38, %c0_39] : memref<32x32xf32, #tpu.memory_space<vmem>>, vector<32x32xf32>
    %cst_40 = arith.constant dense<0.000000e+00> : vector<32x32xf32>
    %69 = tpu.matmul %66, %66, %cst_40 {dimension_numbers = #tpu.dot_dimension_numbers<[0], [0], [1], [1], [0, 1, 1, 1], [], []>} : vector<8x32xf32>, vector<8x32xf32>, vector<32x32xf32> -> vector<32x32xf32>
    %70 = arith.addf %68, %69 : vector<32x32xf32>
    %c0_41 = arith.constant 0 : index
    %c0_42 = arith.constant 0 : index
    %71 = vector.load %arg12[%c0_41, %c0_42] : memref<32x32xf32, #tpu.memory_space<vmem>>, vector<32x32xf32>
    tpu.vector_store %arg12[%c0_41, %c0_42], %70 {strides = array<i32>} : memref<32x32xf32, #tpu.memory_space<vmem>>, vector<32x32xf32>,
    %c0_43 = arith.constant 0 : index
    %c0_44 = arith.constant 0 : index
    %72 = vector.load %arg13[%c0_43, %c0_44] : memref<32x32xf32, #tpu.memory_space<vmem>>, vector<32x32xf32>
    %cst_45 = arith.constant dense<0.000000e+00> : vector<32x32xf32>
    %73 = tpu.matmul %66, %67, %cst_45 {dimension_numbers = #tpu.dot_dimension_numbers<[0], [0], [1], [1], [0, 1, 1, 1], [], []>} : vector<8x32xf32>, vector<8x32xf32>, vector<32x32xf32> -> vector<32x32xf32>
    %74 = arith.addf %72, %73 : vector<32x32xf32>
    %c0_46 = arith.constant 0 : index
    %c0_47 = arith.constant 0 : index
    %75 = vector.load %arg13[%c0_46, %c0_47] : memref<32x32xf32, #tpu.memory_space<vmem>>, vector<32x32xf32>
    tpu.vector_store %arg13[%c0_46, %c0_47], %74 {strides = array<i32>} : memref<32x32xf32, #tpu.memory_space<vmem>>, vector<32x32xf32>,
    %c0_48 = arith.constant 0 : index
    %c0_49 = arith.constant 0 : index
    %76 = vector.load %arg14[%c0_48, %c0_49] : memref<32x32xf32, #tpu.memory_space<vmem>>, vector<32x32xf32>
    %cst_50 = arith.constant dense<0.000000e+00> : vector<32x32xf32>
    %77 = tpu.matmul %67, %67, %cst_50 {dimension_numbers = #tpu.dot_dimension_numbers<[0], [0], [1], [1], [0, 1, 1, 1], [], []>} : vector<8x32xf32>, vector<8x32xf32>, vector<32x32xf32> -> vector<32x32xf32>
    %78 = arith.addf %76, %77 : vector<32x32xf32>
    %c0_51 = arith.constant 0 : index
    %c0_52 = arith.constant 0 : index
    %79 = vector.load %arg14[%c0_51, %c0_52] : memref<32x32xf32, #tpu.memory_space<vmem>>, vector<32x32xf32>
    tpu.vector_store %arg14[%c0_51, %c0_52], %78 {strides = array<i32>} : memref<32x32xf32, #tpu.memory_space<vmem>>, vector<32x32xf32>,
    %c0_i32_53 = arith.constant 0 : i32
    %80 = arith.cmpi eq, %arg0, %c0_i32_53 : i32
    %81 = arith.extui %80 : i1 to i32
    %c0_i32_54 = arith.constant 0 : i32
    %82 = arith.cmpi ne, %81, %c0_i32_54 : i32
    scf.if %82 {
      %c0_55 = arith.constant 0 : index
      %c0_56 = arith.constant 0 : index
      %83 = vector.load %arg7[%c0_55, %c0_56] : memref<1x8xf32, #tpu.memory_space<vmem>>, vector<1x8xf32>
      %c0_57 = arith.constant 0 : index
      %c0_58 = arith.constant 0 : index
      %84 = vector.load %arg8[%c0_57, %c0_58] : memref<1x8xf32, #tpu.memory_space<vmem>>, vector<1x8xf32>
      %85 = math.log %84 : vector<1x8xf32>
      %86 = arith.addf %83, %85 : vector<1x8xf32>
      %87 = vector.shape_cast %86 : vector<1x8xf32> to vector<1x1x8xf32>
      %cst_59 = arith.constant dense<0.000000e+00> : vector<1xf32>
      %88 = vector.multi_reduction <add>, %87, %cst_59 [1, 2] : vector<1x1x8xf32> to vector<1xf32>
      %89 = vector.shape_cast %88 : vector<1xf32> to vector<1x1x1xf32>
      %90 = vector.extract %89[0, 0, 0] : f32 from vector<1x1x1xf32>
      %c0_60 = arith.constant 0 : index
      %c0_61 = arith.constant 0 : index
      %91 = vector.load %arg9[%c0_60, %c0_61] : memref<1x1xf32, #tpu.memory_space<vmem>>, vector<1x1xf32>
      %92 = vector.shape_cast %91 : vector<1x1xf32> to vector<1x1x1xf32>
      %cst_62 = arith.constant dense<0.000000e+00> : vector<1xf32>
      %93 = vector.multi_reduction <add>, %92, %cst_62 [1, 2] : vector<1x1x1xf32> to vector<1xf32>
      %94 = vector.shape_cast %93 : vector<1xf32> to vector<1x1x1xf32>
      %95 = vector.extract %94[0, 0, 0] : f32 from vector<1x1x1xf32>
      %c0_63 = arith.constant 0 : index
      %c0_64 = arith.constant 0 : index
      %96 = vector.load %arg10[%c0_63, %c0_64] : memref<1x1xf32, #tpu.memory_space<vmem>>, vector<1x1xf32>
      %97 = vector.shape_cast %96 : vector<1x1xf32> to vector<1x1x1xf32>
      %cst_65 = arith.constant dense<0.000000e+00> : vector<1xf32>
      %98 = vector.multi_reduction <add>, %97, %cst_65 [1, 2] : vector<1x1x1xf32> to vector<1xf32>
      %99 = vector.shape_cast %98 : vector<1xf32> to vector<1x1x1xf32>
      %100 = vector.extract %99[0, 0, 0] : f32 from vector<1x1x1xf32>
      %101 = arith.subf %90, %95 : f32
      %cst_66 = arith.constant 8.000000e+00 : f32
      %102 = arith.divf %101, %cst_66 : f32
      %103 = arith.subf %100, %95 : f32
      %cst_67 = arith.constant 8.000000e+00 : f32
      %104 = arith.divf %103, %cst_67 : f32
      %c0_68 = arith.constant 0 : index
      %c0_69 = arith.constant 0 : index
      %105 = vector.load %arg11[%c0_68, %c0_69] : memref<1x1xf32, #tpu.memory_space<vmem>>, vector<1x1xf32>
      %106 = vector.shape_cast %105 : vector<1x1xf32> to vector<1x1x1xf32>
      %cst_70 = arith.constant dense<0.000000e+00> : vector<1xf32>
      %107 = vector.multi_reduction <add>, %106, %cst_70 [1, 2] : vector<1x1x1xf32> to vector<1xf32>
      %108 = vector.shape_cast %107 : vector<1xf32> to vector<1x1x1xf32>
      %109 = vector.extract %108[0, 0, 0] : f32 from vector<1x1x1xf32>
      %cst_71 = arith.constant 8.000000e+00 : f32
      %cst_72 = arith.constant 8.000000e+00 : f32
      %110 = arith.mulf %cst_71, %cst_72 : f32
      %111 = arith.divf %109, %110 : f32
      %c0_73 = arith.constant 0 : index
      %c0_74 = arith.constant 0 : index
      %112 = vector.load %arg12[%c0_73, %c0_74] : memref<32x32xf32, #tpu.memory_space<vmem>>, vector<32x32xf32>
      %c0_75 = arith.constant 0 : index
      %c0_76 = arith.constant 0 : index
      %113 = vector.load %arg12[%c0_75, %c0_76] : memref<32x32xf32, #tpu.memory_space<vmem>>, vector<32x32xf32>
      %114 = arith.mulf %112, %113 : vector<32x32xf32>
      %115 = vector.shape_cast %114 : vector<32x32xf32> to vector<1x32x32xf32>
      %cst_77 = arith.constant dense<0.000000e+00> : vector<1xf32>
      %116 = vector.multi_reduction <add>, %115, %cst_77 [1, 2] : vector<1x32x32xf32> to vector<1xf32>
      %117 = vector.shape_cast %116 : vector<1xf32> to vector<1x1x1xf32>
      %118 = vector.extract %117[0, 0, 0] : f32 from vector<1x1x1xf32>
      %c0_78 = arith.constant 0 : index
      %c0_79 = arith.constant 0 : index
      %119 = vector.load %arg13[%c0_78, %c0_79] : memref<32x32xf32, #tpu.memory_space<vmem>>, vector<32x32xf32>
      %c0_80 = arith.constant 0 : index
      %c0_81 = arith.constant 0 : index
      %120 = vector.load %arg13[%c0_80, %c0_81] : memref<32x32xf32, #tpu.memory_space<vmem>>, vector<32x32xf32>
      %121 = arith.mulf %119, %120 : vector<32x32xf32>
      %122 = vector.shape_cast %121 : vector<32x32xf32> to vector<1x32x32xf32>
      %cst_82 = arith.constant dense<0.000000e+00> : vector<1xf32>
      %123 = vector.multi_reduction <add>, %122, %cst_82 [1, 2] : vector<1x32x32xf32> to vector<1xf32>
      %124 = vector.shape_cast %123 : vector<1xf32> to vector<1x1x1xf32>
      %125 = vector.extract %124[0, 0, 0] : f32 from vector<1x1x1xf32>
      %cst_83 = arith.constant 2.000000e+00 : f32
      %126 = arith.mulf %cst_83, %125 : f32
      %127 = arith.subf %118, %126 : f32
      %c0_84 = arith.constant 0 : index
      %c0_85 = arith.constant 0 : index
      %128 = vector.load %arg14[%c0_84, %c0_85] : memref<32x32xf32, #tpu.memory_space<vmem>>, vector<32x32xf32>
      %c0_86 = arith.constant 0 : index
      %c0_87 = arith.constant 0 : index
      %129 = vector.load %arg14[%c0_86, %c0_87] : memref<32x32xf32, #tpu.memory_space<vmem>>, vector<32x32xf32>
      %130 = arith.mulf %128, %129 : vector<32x32xf32>
      %131 = vector.shape_cast %130 : vector<32x32xf32> to vector<1x32x32xf32>
      %cst_88 = arith.constant dense<0.000000e+00> : vector<1xf32>
      %132 = vector.multi_reduction <add>, %131, %cst_88 [1, 2] : vector<1x32x32xf32> to vector<1xf32>
      %133 = vector.shape_cast %132 : vector<1xf32> to vector<1x1x1xf32>
      %134 = vector.extract %133[0, 0, 0] : f32 from vector<1x1x1xf32>
      %135 = arith.addf %127, %134 : f32
      %cst_89 = arith.constant 8.000000e+00 : f32
      %cst_90 = arith.constant 8.000000e+00 : f32
      %136 = arith.mulf %cst_89, %cst_90 : f32
      %137 = arith.divf %135, %136 : f32
      %138 = arith.addf %102, %104 : f32
      %cst_91 = arith.constant 5.000000e-01 : f32
      %139 = arith.mulf %cst_91, %138 : f32
      %cst_92 = arith.constant 1.000000e+00 : f32
      %140 = arith.mulf %cst_92, %111 : f32
      %141 = arith.addf %139, %140 : f32
      %cst_93 = arith.constant 1.000000e+00 : f32
      %142 = arith.mulf %cst_93, %137 : f32
      %143 = arith.addf %141, %142 : f32
      %c0_94 = arith.constant 0 : index
      %c0_95 = arith.constant 0 : index
      %144 = memref.load %arg6[%c0_94, %c0_95] : memref<1x1xf32, #tpu.memory_space<smem>>
      memref.store %143, %arg6[%c0_94, %c0_95] : memref<1x1xf32, #tpu.memory_space<smem>>
    } else {
    }
    return
  }
  func.func @transform_0(%arg0: i32) -> i32 {
    %c0_i32 = arith.constant 0 : i32
    %c0_i32_0 = arith.constant 0 : i32
    return %c0_i32 : i32
  }
  func.func @transform_1(%arg0: i32) -> (i32, i32) {
    %c0_i32 = arith.constant 0 : i32
    %c0_i32_0 = arith.constant 0 : i32
    return %arg0, %c0_i32 : i32, i32
  }
  func.func @transform_2(%arg0: i32) -> (i32, i32) {
    %c0_i32 = arith.constant 0 : i32
    %c0_i32_0 = arith.constant 0 : i32
    return %c0_i32, %arg0 : i32, i32
  }
  func.func @transform_3(%arg0: i32) -> (i32, i32) {
    %c0_i32 = arith.constant 0 : i32
    %c0_i32_0 = arith.constant 0 : i32
    return %arg0, %c0_i32 : i32, i32
  }
  func.func @transform_4(%arg0: i32) -> (i32, i32) {
    %c0_i32 = arith.constant 0 : i32
    %c0_i32_0 = arith.constant 0 : i32
    return %arg0, %c0_i32 : i32, i32
  }
  func.func @transform_5(%arg0: i32) -> (i32, i32) {
    %c0_i32 = arith.constant 0 : i32
    %c0_i32_0 = arith.constant 0 : i32
    %c0_i32_1 = arith.constant 0 : i32
    return %c0_i32, %c0_i32_0 : i32, i32
  }
}

</mosaic_0001>

<bundles_post_ra>
// kernel: cyclip_loss.1
= control target key start
LH: loop header
LB: loop body
LE: loop exit
PB: predicated region body
PF: predicated region fallthrough
CT: control target
= control target key end

     0   :  { %11 = vsyncpa [#allocation12], 0  ;;  %s858_s0 = inlined_call_operand.<no memory space> [shape: f32[1], index: 0, kind: input, shape index: {}]   ;;  %s859_s1 = inlined_call_operand.vmem [shape: f32[8,8], index: 1, kind: input, shape index: {}, may-alias: {1,2}]   ;;  %s860_s2 = inlined_call_operand.vmem [shape: f32[8,8], index: 2, kind: input, shape index: {}, may-alias: {1,2}]   ;;  %s861_s3 = inlined_call_operand.hbm [shape: f32[8,32], index: 3, kind: input, shape index: {}]   ;;  %s862_s4 = inlined_call_operand.hbm [shape: f32[8,32], index: 4, kind: input, shape index: {}]   ;;  %s863_s5 = inlined_call_operand.hbm [shape: f32[1,1], index: 5, kind: output, shape index: {}]  }
   0x1   :  { %12 = vsyncpa [#allocation15], 0 }
   0x2   :  { %13 = vsyncpa [#allocation13], 0  ;;  %s25_s20 = sshll.u32 %s861_s3, 4  ;;  %s709_s21 = smov [#allocation11]   ;;  %s26_s20 = int_to_ptr.hbm [resolvable:$true] %s25_s20 }
   0x3   :  { %s27_s22 = sshll.u32 %s709_s21, 4  ;;  %s36_s25 = sshll.u32 %s862_s4, 4  ;;  %s28_s22 = int_to_ptr.vmem [resolvable:$true] %s27_s22  ;;  %s37_s25 = int_to_ptr.hbm [resolvable:$true] %s36_s25 }
   0x4   :  { %30 = dma.hbm_to_vmem [thread:$0]  %s26_s20, 128, %s28_s22, [#allocation12]  }
   0x5   :  { %s710_s26 = smov [#allocation14]  }
   0x6   :  { %s38_s27 = sshll.u32 %s710_s26, 4  ;;  %s39_s27 = int_to_ptr.vmem [resolvable:$true] %s38_s27 }
   0x7   :  { %41 = dma.hbm_to_vmem [thread:$0]  %s37_s25, 128, %s39_s27, [#allocation15]  }
   0x8   :  { %703 = dma.done.wait [#allocation12], 128  }
   0x9   :  { %704 = vsyncadd [#allocation12], 4294967168 }
   0xa   :  { %705 = dma.done.wait [#allocation15], 128  }
   0xb   :  { %706 = vsyncadd [#allocation15], 4294967168  ;;  %v76_v0 = vstv %s858_s0  ;;  %v206_v1 = vld [vmem:[#allocation11] sm:$0xff]  ;;  %vm85_vm0 = vcmask 64512   ;;  %v207_v4 = vld [vmem:[#allocation14] sm:$0xff]  ;;  %v78_v22 = vlaneseq  ;;  %vm54_vm2 = vcmask 57344  }
   0xc   :  { %v758_v2 = vld [vmem:[%s859_s1] sm:$0xff]  ;;  %212 = vxpose.xlu0.b32.start.end [1/1] (short) (narrow) %v206_v1, 32  ;;  %271 = vmatpush.msra.mxu0 %v206_v1  ;;  %v711_v30 = vmov -inf   ;;  %vm61_vm3 = vcmask 261120   ;;  %v712_v32 = vmov 0.0   ;;  %vm113_vm4 = vcmask 7168  }
   0xd   :  { %v761_v3 = vmul.f32 %v76_v0, %v758_v2  ;;  %v157_v5 = vld [vmem:[%s860_s2] sm:$0xff]  ;;  %596 = vmatpush.msra.mxu1 %v207_v4  ;;  %595 = vmatpush.msra.mxu3 %v206_v1  ;;  %v79_v24 = vshrl.u32 %v78_v22, 7  ;;  %v81_v25 = vand.u32 127, %v78_v22  ;;  %55 = vst.msk [vmem:[#allocation2] sm:$0x1] %vm54_vm2, %v711_v30  ;;  %vm57_vm5 = vcmask 0  }
   0xe   :  { %158 = vxpose.xlu2.b32.start.end [1/1] (short) (narrow) %v157_v5, 8  ;;  %313 = vmatpush.msrb.mxu0 %v207_v4  ;;  %62 = vst.msk [vmem:[#allocation7] sm:$0xff] %vm61_vm3, %v712_v32  ;;  %s571_s28 = sshll.u32 %s863_s5, 4  ;;  %s715_s4 = smov [#allocation16]   ;;  %s572_s28 = int_to_ptr.hbm [resolvable:$true] %s571_s28 }
   0xf   :  { %v100_v6 = vsel %vm85_vm0, %v761_v3, -inf  ;;  %597 = vmatpush.msra.mxu2 %v207_v4  ;;  %vm82_vm1 = vcmp.eq.s32.totalorder %v79_v24, %v81_v25  ;;  %63 = vst.msk [vmem:[#allocation7 + $0x8] sm:$0xff] %vm61_vm3, %v712_v32 }
  0x10   :  { %101 = vmax.xlane.f32.xlu1 %v100_v6  ;;  %v128_v19 = vrot.slane %v100_v6, 4  ;;  %v84_v26 = vsel %vm82_vm1, %v761_v3, 0.0  ;;  %64 = vst.msk [vmem:[#allocation7 + $0x10] sm:$0xff] %vm61_vm3, %v712_v32 }
  0x11   :  { %v86_v28 = vsel %vm85_vm0, %v84_v26, 0.0  ;;  %65 = vst.msk [vmem:[#allocation7 + $0x18] sm:$0xff] %vm61_vm3, %v712_v32 }
  0x12   :  { %v129_v20 = vmax.f32 %v100_v6, %v128_v19  ;;  %66 = vst.msk [vmem:[#allocation8] sm:$0xff] %vm61_vm3, %v712_v32 }
  0x13   :  { %67 = vst.msk [vmem:[#allocation8 + $0x8] sm:$0xff] %vm61_vm3, %v712_v32 }
  0x14   :  { %v130_v23 = vrot.slane %v129_v20, 2  ;;  %v127_v33 = vld [vmem:[#allocation2] sm:$0x1]  ;;  %68 = vst.msk [vmem:[#allocation8 + $0x10] sm:$0xff] %vm61_vm3, %v712_v32 }
  0x15   :  { %69 = vst.msk [vmem:[#allocation8 + $0x18] sm:$0xff] %vm61_vm3, %v712_v32 }
  0x16   :  { %v131_v27 = vmax.f32 %v129_v20, %v130_v23  ;;  %70 = vst.msk [vmem:[#allocation9] sm:$0xff] %vm61_vm3, %v712_v32 }
  0x17   :  { %71 = vst.msk [vmem:[#allocation9 + $0x8] sm:$0xff] %vm61_vm3, %v712_v32 }
  0x18   :  { %v132_v29 = vrot.slane %v131_v27, 1  ;;  %72 = vst.msk [vmem:[#allocation9 + $0x10] sm:$0xff] %vm61_vm3, %v712_v32 }
  0x19   :  { %73 = vst.msk [vmem:[#allocation9 + $0x18] sm:$0xff] %vm61_vm3, %v712_v32  ;;  %v294_v6 = vld [vmem:[#allocation8] sm:$0xff] }
  0x1a   :  { %v133_v31 = vmax.f32 %v131_v27, %v132_v29  ;;  %56 = vst.msk [vmem:[#allocation3] sm:$0x1] %vm54_vm2, %v712_v32  ;;  %v211_v27 = vld [vmem:[#allocation7 + $0x18] sm:$0xff] }
  0x1b   :  { %58 = vst.msk [vmem:[#allocation4] sm:$0x1] %vm57_vm5, %v712_v32 }
  0x1c   :  { %v134_v34 = vmax.f32 %v127_v33, %v133_v31  ;;  %59 = vst.msk [vmem:[#allocation5] sm:$0x1] %vm57_vm5, %v712_v32 }
  0x1d   :  { %v335_v31 = vld [vmem:[#allocation9] sm:$0xff]  ;;  %60 = vst.msk [vmem:[#allocation6] sm:$0x1] %vm57_vm5, %v712_v32 }
  0x1e   :  { %v141_v35 = vperm.slane %v134_v34, 0  ;;  %156 = vst.msk [vmem:[#allocation2] sm:$0x1] %vm54_vm2, %v134_v34  ;;  %v136_v43 = vsub.f32 %v127_v33, %v134_v34 }
  0x20   :  { %v143_v36 = vsub.f32 %v761_v3, %v141_v35  ;;  %v137_v47 = vmul.f32 1.442695, %v136_v43 }
  0x21   :  { %v135_v56 = vld [vmem:[#allocation3] sm:$0x1] }
  0x22   :  { %v144_v37 = vmul.f32 1.442695, %v143_v36 }
  0x25   :  { %v423_v63 = vld [vmem:[#allocation2] sm:$0x1] }
  0x2c   :  { %339 = vxpose.xlu0.b32.start.end [1/1] (short) (narrow) %v207_v4, 32 }
  0x7f   :  { %87 = vadd.xlane.f32.xlu2 %v86_v28 }
  0x83   :  { %v768_v7 = vpop.xlane.xlu1 %101 }
  0x84   :  { %v103_v8 = vsub.f32 %v761_v3, %v768_v7 }
  0x86   :  { %v104_v9 = vmul.f32 1.442695, %v103_v8 }
  0x88   :  { %629 = vpow2.f32 %v104_v9 }
  0x8e   :  { %v630_v10 = vpop.eup %629 }
  0x8f   :  { %v106_v11 = vsel %vm85_vm0, %v630_v10, 0.0 }
  0x90   :  { %107 = vadd.xlane.f32.xlu1 %v106_v11 }
  0xa7   :  { %v174_v40 = vpop.trf.xlu2 }
  0xa8   :  { %v190_v46 = vsub.f32 %v758_v2, %v174_v40  ;;  %v208_v2 = vld [vmem:[#allocation7] sm:$0xff] }
  0xaa   :  { %v192_v51 = vmul.f32 %v190_v46, %v190_v46 }
  0xac   :  { %v193_v55 = vsel %vm85_vm0, %v192_v51, 0.0 }
  0xb0   :  { %v228_v12 = vpop.trf.xlu0 }
  0xb1   :  { %583 = vmatmul.msk.f32.vlgmr.msra.gmra.mxu0 %vm85_vm0, %v228_v12 }
  0xb2   :  { %398 = vmatpush.msra.mxu0 %v207_v4 }
  0xb8   :  { %v229_v13 = vpop.trf.xlu0 }
  0xb9   :  { %584 = vmatmul.msk.f32.vlgmr.msra.gmra.mxu3 %vm85_vm0, %v229_v13  ;;  %587 = vmatmul.msk.f32.vlgmr.msrb.gmra.mxu0 %vm85_vm0, %v228_v12  ;;  %v209_v12 = vld [vmem:[#allocation7 + $0x8] sm:$0xff] }
  0xba   :  { %588 = vmatmul.msk.f32.vlgmr.msra.gmra.mxu1 %vm85_vm0, %v229_v13 }
  0xc0   :  { %v230_v14 = vpop.trf.xlu0 }
  0xc1   :  { %585 = vmatmul.msk.f32.gmra.mxu3 %vm85_vm0, %v230_v14 }
  0xc2   :  { %589 = vmatmul.msk.f32.gmra.mxu1 %vm85_vm0, %v230_v14 }
  0xc8   :  { %v231_v15 = vpop.trf.xlu0 }
  0xc9   :  { %586 = vmatmul.msk.f32.gmra.mxu3 %vm85_vm0, %v231_v15 }
  0xca   :  { %590 = vmatmul.msk.f32.gmra.mxu1 %vm85_vm0, %v231_v15  ;;  %v296_v15 = vld [vmem:[#allocation8 + $0x10] sm:$0xff] }
  0xd0   :  { %v355_v16 = vpop.trf.xlu0 }
  0xd1   :  { %591 = vmatmul.msk.f32.vlgmr.msra.gmra.mxu0 %vm85_vm0, %v355_v16 }
  0xd8   :  { %v356_v17 = vpop.trf.xlu0 }
  0xd9   :  { %592 = vmatmul.msk.f32.vlgmr.msra.gmra.mxu2 %vm85_vm0, %v356_v17 }
  0xe0   :  { %v357_v18 = vpop.trf.xlu0 }
  0xe1   :  { %593 = vmatmul.msk.f32.gmra.mxu2 %vm85_vm0, %v357_v18  ;;  %v210_v18 = vld [vmem:[#allocation7 + $0x10] sm:$0xff] }
  0xe8   :  { %v358_v21 = vpop.trf.xlu0 }
  0xe9   :  { %594 = vmatmul.msk.f32.gmra.mxu2 %vm85_vm0, %v358_v21  ;;  %v297_v21 = vld [vmem:[#allocation8 + $0x18] sm:$0xff] }
 0x103   :  { %v108_v38 = vpop.xlane.xlu1 %107 }
 0x104   :  { %631 = vlog2.f32 %v108_v38 }
 0x105   :  { %633 = vpow2.f32 %v144_v37 }
 0x106   :  { %635 = vpow2.f32 %v137_v47 }
 0x10a   :  { %v632_v39 = vpop.eup %631 }
 0x10b   :  { %v634_v41 = vpop.eup %633  ;;  %v110_v42 = vmul.f32 0.6931472, %v632_v39 }
 0x10c   :  { %v146_v44 = vsel %vm85_vm0, %v634_v41, 0.0  ;;  %v636_v54 = vpop.eup %635 }
 0x10d   :  { %v111_v45 = vadd.f32 %v110_v42, %v768_v7  ;;  %v147_v48 = vrot.slane %v146_v44, 4  ;;  %v139_v58 = vmul.f32 %v636_v54, %v135_v56  ;;  %v295_v7 = vld [vmem:[#allocation8 + $0x8] sm:$0xff] }
 0x10f   :  { %v114_v49 = vsel %vm113_vm4, %v111_v45, 0.0  ;;  %v148_v50 = vadd.f32 %v147_v48, %v146_v44 }
 0x110   :  { %115 = vadd.xlane.f32.xlu1 %v114_v49 }
 0x111   :  { %v149_v52 = vrot.slane %v148_v50, 2 }
 0x113   :  { %v150_v53 = vadd.f32 %v149_v52, %v148_v50 }
 0x115   :  { %v151_v57 = vrot.slane %v150_v53, 1 }
 0x117   :  { %v152_v59 = vadd.f32 %v151_v57, %v150_v53 }
 0x118   :  { %194 = vadd.xlane.f32.xlu1 %v193_v55 }
 0x119   :  { %v153_v60 = vadd.f32 %v152_v59, %v139_v58 }
 0x11b   :  { %155 = vst.msk [vmem:[#allocation3] sm:$0x1] %vm54_vm2, %v153_v60  ;;  %v336_v60 = vld [vmem:[#allocation9 + $0x8] sm:$0xff] }
 0x122   :  { %v424_v61 = vld [vmem:[#allocation3] sm:$0x1] }
 0x123   :  { %637 = vlog2.f32 %v424_v61 }
 0x129   :  { %v638_v62 = vpop.eup %637 }
 0x12a   :  { %v426_v0 = vmul.f32 0.6931472, %v638_v62 }
 0x12c   :  { %v427_v1 = vadd.f32 %v426_v0, %v423_v63  ;;  %v337_v0 = vld [vmem:[#allocation9 + $0x10] sm:$0xff] }
 0x12e   :  { %v428_v3 = vsel %vm54_vm2, %v427_v1, 0.0  ;;  %v273_v4 = vpop.f32.mrf.mxu0  ;;  %v88_v1 = vpop.xlane.xlu2 %87 }
 0x12f   :  { %429 = vadd.xlane.f32.xlu1 %v428_v3  ;;  %v285_v5 = vadd.f32 %v273_v4, %v208_v2  ;;  %v89_v3 = vrot.slane %v88_v1, 4 }
 0x131   :  { %290 = vst.msk [vmem:[#allocation7] sm:$0xff] %vm61_vm3, %v285_v5  ;;  %v90_v5 = vadd.f32 %v89_v3, %v88_v1  ;;  %v191_v1 = vld [vmem:[#allocation6] sm:$0x1] }
 0x136   :  { %v315_v8 = vpop.f32.mrf.mxu0 }
 0x137   :  { %v327_v9 = vadd.f32 %v315_v8, %v294_v6  ;;  %v318_v10 = vpop.f32.mrf.mxu1  ;;  %v91_v6 = vrot.slane %v90_v5, 2 }
 0x138   :  { %v328_v11 = vadd.f32 %v318_v10, %v295_v7  ;;  %v476_v39 = vld [vmem:[#allocation7] sm:$0xff]  ;;  %v338_v7 = vld [vmem:[#allocation9 + $0x18] sm:$0xff] }
 0x139   :  { %331 = vst.msk [vmem:[#allocation8] sm:$0xff] %vm61_vm3, %v327_v9  ;;  %v480_v46 = vmul.f32 %v476_v39, %v476_v39  ;;  %v92_v8 = vadd.f32 %v91_v6, %v90_v5 }
 0x13a   :  { %332 = vst.msk [vmem:[#allocation8 + $0x8] sm:$0xff] %vm61_vm3, %v328_v11 }
 0x13b   :  { %v484_v53 = vsel %vm61_vm3, %v480_v46, 0.0  ;;  %v93_v11 = vrot.slane %v92_v8, 1 }
 0x13c   :  { %v276_v13 = vpop.f32.mrf.mxu3 }
 0x13d   :  { %v286_v14 = vadd.f32 %v276_v13, %v209_v12 }
 0x13f   :  { %291 = vst.msk [vmem:[#allocation7 + $0x8] sm:$0xff] %vm61_vm3, %v286_v14  ;;  %v321_v16 = vpop.f32.mrf.mxu1 }
 0x140   :  { %v329_v17 = vadd.f32 %v321_v16, %v296_v15  ;;  %v500_v23 = vld [vmem:[#allocation8] sm:$0xff]  ;;  %v94_v15 = vadd.f32 %v93_v11, %v92_v8 }
 0x141   :  { %v501_v24 = vld [vmem:[#allocation8 + $0x8] sm:$0xff]  ;;  %v504_v28 = vmul.f32 %v500_v23, %v500_v23 }
 0x142   :  { %333 = vst.msk [vmem:[#allocation8 + $0x10] sm:$0xff] %vm61_vm3, %v329_v17  ;;  %v505_v29 = vmul.f32 %v501_v24, %v501_v24 }
 0x143   :  { %v508_v37 = vsel %vm61_vm3, %v504_v28, 0.0  ;;  %598 = vpush %v94_v15 }
 0x144   :  { %v279_v19 = vpop.f32.mrf.mxu3  ;;  %v509_v38 = vsel %vm61_vm3, %v505_v29, 0.0 }
 0x145   :  { %v287_v20 = vadd.f32 %v279_v19, %v210_v18  ;;  %v510_v45 = vadd.f32 %v509_v38, %v508_v37 }
 0x146   :  { %v477_v34 = vld [vmem:[#allocation7 + $0x8] sm:$0xff] }
 0x147   :  { %292 = vst.msk [vmem:[#allocation7 + $0x10] sm:$0xff] %vm61_vm3, %v287_v20  ;;  %v324_v22 = vpop.f32.mrf.mxu1  ;;  %v481_v42 = vmul.f32 %v477_v34, %v477_v34 }
 0x148   :  { %v330_v25 = vadd.f32 %v324_v22, %v297_v21 }
 0x149   :  { %v502_v26 = vld [vmem:[#allocation8 + $0x10] sm:$0xff]  ;;  %v485_v50 = vsel %vm61_vm3, %v481_v42, 0.0 }
 0x14a   :  { %334 = vst.msk [vmem:[#allocation8 + $0x18] sm:$0xff] %vm61_vm3, %v330_v25  ;;  %v506_v33 = vmul.f32 %v502_v26, %v502_v26  ;;  %v486_v56 = vadd.f32 %v485_v50, %v484_v53  ;;  %v713_v53 = vmov 8.0  }
 0x14b   :  { %639 = vrcp.f32 %v713_v53 }
 0x14c   :  { %v282_v30 = vpop.f32.mrf.mxu3  ;;  %v511_v43 = vsel %vm61_vm3, %v506_v33, 0.0 }
 0x14d   :  { %v288_v35 = vadd.f32 %v282_v30, %v211_v27  ;;  %v512_v49 = vadd.f32 %v511_v43, %v510_v45  ;;  %v83_v43 = vld [vmem:[#allocation4] sm:$0x1] }
 0x14e   :  { %v400_v36 = vpop.f32.mrf.mxu0  ;;  %v478_v40 = vld [vmem:[#allocation7 + $0x10] sm:$0xff] }
 0x14f   :  { %293 = vst.msk [vmem:[#allocation7 + $0x18] sm:$0xff] %vm61_vm3, %v288_v35  ;;  %v412_v41 = vadd.f32 %v400_v36, %v335_v31  ;;  %v482_v47 = vmul.f32 %v478_v40, %v478_v40 }
 0x151   :  { %416 = vst.msk [vmem:[#allocation9] sm:$0xff] %vm61_vm3, %v412_v41  ;;  %v503_v44 = vld [vmem:[#allocation8 + $0x18] sm:$0xff]  ;;  %v487_v54 = vsel %vm61_vm3, %v482_v47, 0.0 }
 0x152   :  { %v507_v48 = vmul.f32 %v503_v44, %v503_v44  ;;  %v488_v58 = vadd.f32 %v487_v54, %v486_v56  ;;  %v640_v54 = vpop.eup %639 }
 0x153   :  { %v446_v56 = vmul.f32 8.0, %v640_v54  ;;  %vm450_vm6 = vweird.f32 %v640_v54 }
 0x154   :  { %v513_v51 = vsel %vm61_vm3, %v507_v48, 0.0 }
 0x155   :  { %v514_v52 = vadd.f32 %v513_v51, %v512_v49 }
 0x156   :  { %v479_v55 = vld [vmem:[#allocation7 + $0x18] sm:$0xff] }
 0x157   :  { %515 = vadd.xlane.f32.xlu1 %v514_v52  ;;  %v483_v57 = vmul.f32 %v479_v55, %v479_v55  ;;  %v714_v55 = vmov 64.0  }
 0x158   :  { %v526_v13 = vld [vmem:[#allocation9] sm:$0xff]  ;;  %641 = vrcp.f32 %v714_v55 }
 0x159   :  { %v489_v59 = vsel %vm61_vm3, %v483_v57, 0.0  ;;  %v530_v17 = vmul.f32 %v526_v13, %v526_v13 }
 0x15a   :  { %v490_v61 = vadd.f32 %v489_v59, %v488_v58  ;;  %v112_v58 = vld [vmem:[#allocation5] sm:$0x1]  ;;  %v447_v59 = vsub.f32 1.0, %v446_v56 }
 0x15b   :  { %v534_v20 = vsel %vm61_vm3, %v530_v17, 0.0 }
 0x15c   :  { %v403_v62 = vpop.f32.mrf.mxu2  ;;  %491 = vadd.xlane.f32.xlu0 %v490_v61 }
 0x15d   :  { %v413_v63 = vadd.f32 %v403_v62, %v336_v60 }
 0x15e   :  { %v642_v57 = vpop.eup %641 }
 0x15f   :  { %417 = vst.msk [vmem:[#allocation9 + $0x8] sm:$0xff] %vm61_vm3, %v413_v63  ;;  %v468_v62 = vmul.f32 64.0, %v642_v57  ;;  %v448_v63 = vmul.f32 %v640_v54, %v447_v59  ;;  %vm472_vm7 = vweird.f32 %v642_v57 }
 0x164   :  { %v406_v2 = vpop.f32.mrf.mxu2 }
 0x165   :  { %v414_v4 = vadd.f32 %v406_v2, %v337_v0  ;;  %v469_v0 = vsub.f32 1.0, %v468_v62  ;;  %v449_v2 = vadd.f32 %v640_v54, %v448_v63 }
 0x166   :  { %v527_v10 = vld [vmem:[#allocation9 + $0x8] sm:$0xff] }
 0x167   :  { %418 = vst.msk [vmem:[#allocation9 + $0x10] sm:$0xff] %vm61_vm3, %v414_v4  ;;  %v531_v16 = vmul.f32 %v527_v10, %v527_v10  ;;  %v470_v6 = vmul.f32 %v642_v57, %v469_v0 }
 0x169   :  { %v535_v19 = vsel %vm61_vm3, %v531_v16, 0.0  ;;  %v471_v11 = vadd.f32 %v642_v57, %v470_v6 }
 0x16a   :  { %v536_v23 = vadd.f32 %v535_v19, %v534_v20 }
 0x16b   :  { %v473_v16 = vsel %vm472_vm7, %v642_v57, %v471_v11 }
 0x16c   :  { %v409_v9 = vpop.f32.mrf.mxu2 }
 0x16d   :  { %v415_v12 = vadd.f32 %v409_v9, %v338_v7  ;;  %v451_v9 = vsel %vm450_vm6, %v640_v54, %v449_v2 }
 0x16e   :  { %v528_v14 = vld [vmem:[#allocation9 + $0x10] sm:$0xff] }
 0x16f   :  { %419 = vst.msk [vmem:[#allocation9 + $0x18] sm:$0xff] %vm61_vm3, %v415_v12  ;;  %v532_v18 = vmul.f32 %v528_v14, %v528_v14 }
 0x171   :  { %v537_v21 = vsel %vm61_vm3, %v532_v18, 0.0 }
 0x172   :  { %v538_v25 = vadd.f32 %v537_v21, %v536_v23 }
 0x174   :  { %s599_s0 = spop %598 }
 0x175   :  { %v96_v46 = vstv %s599_s0 }
 0x176   :  { %v529_v22 = vld [vmem:[#allocation9 + $0x18] sm:$0xff]  ;;  %v97_v47 = vadd.f32 %v96_v46, %v83_v43 }
 0x177   :  { %v533_v24 = vmul.f32 %v529_v22, %v529_v22 }
 0x178   :  { %99 = vst.msk [vmem:[#allocation4] sm:$0x1] %vm57_vm5, %v97_v47 }
 0x179   :  { %v539_v26 = vsel %vm61_vm3, %v533_v24, 0.0 }
 0x17a   :  { %v540_v27 = vadd.f32 %v539_v26, %v538_v25 }
 0x17c   :  { %541 = vadd.xlane.f32.xlu1 %v540_v27 }
 0x17f   :  { %v438_v52 = vld [vmem:[#allocation4] sm:$0x1] }
 0x183   :  { %v116_v28 = vpop.xlane.xlu1 %115 }
 0x184   :  { %v117_v29 = vrot.slane %v116_v28, 4 }
 0x186   :  { %v118_v30 = vadd.f32 %v117_v29, %v116_v28 }
 0x188   :  { %v119_v31 = vrot.slane %v118_v30, 2 }
 0x18a   :  { %v120_v33 = vadd.f32 %v119_v31, %v118_v30 }
 0x18b   :  { %v195_v34 = vpop.xlane.xlu1 %194 }
 0x18c   :  { %v196_v35 = vrot.slane %v195_v34, 4  ;;  %v121_v36 = vrot.slane %v120_v33, 1 }
 0x18e   :  { %v197_v37 = vadd.f32 %v196_v35, %v195_v34  ;;  %v122_v38 = vadd.f32 %v121_v36, %v120_v33 }
 0x190   :  { %v198_v39 = vrot.slane %v197_v37, 2  ;;  %600 = vpush %v122_v38 }
 0x192   :  { %v199_v40 = vadd.f32 %v198_v39, %v197_v37 }
 0x194   :  { %v200_v41 = vrot.slane %v199_v40, 1 }
 0x196   :  { %v201_v42 = vadd.f32 %v200_v41, %v199_v40 }
 0x198   :  { %602 = vpush %v201_v42 }
 0x1a2   :  { %v430_v44 = vpop.xlane.xlu1 %429 }
 0x1a3   :  { %v431_v45 = vrot.slane %v430_v44, 4 }
 0x1a5   :  { %v432_v48 = vadd.f32 %v431_v45, %v430_v44 }
 0x1a7   :  { %v433_v32 = vrot.slane %v432_v48, 2 }
 0x1a9   :  { %v434_v49 = vadd.f32 %v433_v32, %v432_v48 }
 0x1ab   :  { %v435_v50 = vrot.slane %v434_v49, 1 }
 0x1ad   :  { %v436_v51 = vadd.f32 %v435_v50, %v434_v49 }
 0x1af   :  { %604 = vpush %v436_v51 }
 0x1b0   :  { %606 = vpush %v438_v52 }
 0x1c1   :  { %s601_s1 = spop %600 }
 0x1c2   :  { %v124_v60 = vstv %s601_s1 }
 0x1c3   :  { %v125_v61 = vadd.f32 %v124_v60, %v112_v58 }
 0x1c5   :  { %126 = vst.msk [vmem:[#allocation5] sm:$0x1] %vm57_vm5, %v125_v61 }
 0x1c9   :  { %s603_s2 = spop %602 }
 0x1ca   :  { %v203_v3 = vstv %s603_s2  ;;  %v516_v5 = vpop.xlane.xlu1 %515 }
 0x1cb   :  { %v204_v4 = vadd.f32 %v203_v3, %v191_v1  ;;  %v517_v7 = vrot.slane %v516_v5, 4 }
 0x1cc   :  { %v441_v8 = vld [vmem:[#allocation5] sm:$0x1] }
 0x1cd   :  { %205 = vst.msk [vmem:[#allocation6] sm:$0x1] %vm57_vm5, %v204_v4  ;;  %v518_v10 = vadd.f32 %v517_v7, %v516_v5 }
 0x1ce   :  { %608 = vpush %v441_v8 }
 0x1cf   :  { %610 = vpush %v451_v9  ;;  %v519_v12 = vrot.slane %v518_v10, 2  ;;  %v492_v13 = vpop.xlane.xlu0 %491 }
 0x1d0   :  { %v493_v14 = vrot.slane %v492_v13, 4 }
 0x1d1   :  { %v520_v18 = vadd.f32 %v519_v12, %v518_v10 }
 0x1d2   :  { %v494_v15 = vadd.f32 %v493_v14, %v492_v13 }
 0x1d3   :  { %v521_v21 = vrot.slane %v520_v18, 1 }
 0x1d4   :  { %v464_v17 = vld [vmem:[#allocation6] sm:$0x1]  ;;  %v495_v19 = vrot.slane %v494_v15, 2 }
 0x1d5   :  { %612 = vpush %v464_v17  ;;  %v522_v24 = vadd.f32 %v521_v21, %v520_v18 }
 0x1d6   :  { %614 = vpush %v473_v16  ;;  %v496_v20 = vadd.f32 %v495_v19, %v494_v15 }
 0x1d8   :  { %v497_v22 = vrot.slane %v496_v20, 1 }
 0x1da   :  { %v498_v23 = vadd.f32 %v497_v22, %v496_v20 }
 0x1dc   :  { %616 = vpush %v498_v23 }
 0x1dd   :  { %618 = vpush %v522_v24 }
 0x1e0   :  { %s605_s7 = spop %604 }
 0x1e1   :  { %s607_s8 = spop %606 }
 0x1e2   :  { %s444_s12 = ssub.f32 %s605_s7, %s607_s8 }
 0x1ef   :  { %v542_v25 = vpop.xlane.xlu1 %541 }
 0x1f0   :  { %v543_v26 = vrot.slane %v542_v25, 4 }
 0x1f2   :  { %v544_v27 = vadd.f32 %v543_v26, %v542_v25 }
 0x1f4   :  { %v545_v28 = vrot.slane %v544_v27, 2 }
 0x1f6   :  { %v546_v29 = vadd.f32 %v545_v28, %v544_v27 }
 0x1f8   :  { %v547_v30 = vrot.slane %v546_v29, 1 }
 0x1fa   :  { %v548_v31 = vadd.f32 %v547_v30, %v546_v29 }
 0x1fc   :  { %620 = vpush %v548_v31 }
 0x1ff   :  { %s609_s9 = spop %608 }
 0x200   :  { %s611_s10 = spop %610  ;;  %s454_s13 = ssub.f32 %s609_s9, %s607_s8 }
 0x201   :  { %s453_s16 = smul.f32 %s611_s10, %s444_s12 }
 0x202   :  { %s463_s18 = smul.f32 %s611_s10, %s454_s13 }
 0x204   :  { %s560_s20 = sadd.f32 %s463_s18, %s453_s16 }
 0x206   :  { %s613_s11 = spop %612  ;;  %s561_s24 = smul.f32 0.5, %s560_s20 }
 0x207   :  { %s615_s14 = spop %614 }
 0x208   :  { %s475_s21 = smul.f32 %s615_s14, %s613_s11 }
 0x20a   :  { %s562_s3 = sadd.f32 %s561_s24, %s475_s21 }
 0x20d   :  { %s617_s15 = spop %616 }
 0x20e   :  { %s619_s17 = spop %618 }
 0x20f   :  { %s524_s19 = smul.f32 2.0, %s619_s17 }
 0x211   :  { %s525_s22 = ssub.f32 %s617_s15, %s524_s19 }
 0x22d   :  { %s621_s23 = spop %620 }
 0x22e   :  { %s550_s25 = sadd.f32 %s621_s23, %s525_s22 }
 0x230   :  { %s559_s29 = smul.f32 %s615_s14, %s550_s25 }
 0x232   :  { %s563_s30 = sadd.f32 %s562_s3, %s559_s29 }
 0x234   :  { %565 = sst [smem:[#allocation16]] %s563_s30 }
 0x235   :  { %574 = dma.smem_to_hbm %s715_s4, 16, %s572_s28, [#allocation13]  }
 0x236   :  { %707 = dma.done.wait [#allocation13], 16  }
 0x237   :  { %708 = vsyncadd [#allocation13], 4294967280 }
 0x238   :  { %579 = sfence }
 0x239   :  { %580 = vsyncpa [#allocation12], 1 }
 0x23a   :  { %581 = vsyncpa [#allocation15], 1 }
 0x23b   :  { %582 = vsyncpa [#allocation13], 1 }

</bundles_post_ra>
